<compile_context>
chip_gen: v7x
topology: tpu7x:2x2x1
jax: 0.10.0
libtpu: 0.0.40
codegen_flags: <defaults>
</compile_context>

<pallas_src>
import functools

import jax
import jax.numpy as jnp
from jax.experimental import pallas as pl
from jax.experimental.pallas import tpu as pltpu


_NEG_BIG = -1e30  # additive softmax mask; safe exponent range in f32/bf16


def _round_up(n, m):
    return ((n + m - 1) // m) * m


def fused_actor_critic_kernel(x_ref, w1_ref, b1_ref, w2_ref, b2_ref,
                              w3_ref, b3_ref, out_ref, *, action_dim):
    """One batch tile: 3 block-structured matmuls + masked-softmax epilogue."""
    x = x_ref[...]                                            # bf16 (TB, state_dim)

    # Fused layer 1: x @ [Wa1 | Wc1]  (one MXU pass for both heads).
    h = jnp.dot(x, w1_ref[...], preferred_element_type=jnp.float32) + b1_ref[...]
    h = jnp.maximum(h, 0.0).astype(w2_ref.dtype)              # f32 ReLU -> bf16 operand

    # Fused layer 2: blockdiag(Wa2, Wc2) -> no cross-talk between heads.
    h = jnp.dot(h, w2_ref[...], preferred_element_type=jnp.float32) + b2_ref[...]
    h = jnp.maximum(h, 0.0).astype(w3_ref.dtype)

    # Fused layer 3, lane-padded to 128 output lanes:
    #   lanes [0, action_dim) = actor logits, lane action_dim = critic value,
    #   remaining lanes       = exact zeros (zero weights + zero bias).
    h3 = jnp.dot(h, w3_ref[...], preferred_element_type=jnp.float32) + b3_ref[...]

    # (1, 128) lane index is a compile-time constant; broadcasts against (TB,128).
    col = jax.lax.broadcasted_iota(jnp.int32, (1, out_ref.shape[-1]), 1)
    is_logit = col < action_dim

    # Numerically-stable masked softmax over the logit lanes, exact divide
    # (memory-bound kernel -> the extra VALU divide is free; rows sum to 1).
    logits = jnp.where(is_logit, h3, _NEG_BIG)
    m = jnp.max(logits, axis=-1, keepdims=True)
    e = jnp.exp(logits - m)                                   # masked lanes -> 0
    s = jnp.sum(e, axis=-1, keepdims=True)
    probs = e / s

    # Single fused select + one lane-dense store:
    #   logit lanes -> probs, lane `action_dim` -> value, pad lanes -> 0.
    out_ref[...] = jnp.where(col == action_dim, h3, probs).astype(out_ref.dtype)


def pack_params(params, *, matmul_dtype=jnp.bfloat16):
    """One-time packing of PyTorch-convention params into fused kernel operands.

    (out, in) weights -> (in, out); actor/critic fused by concat (layer 1) and
    block-diagonal (layers 2/3); final layer lane-padded to 128 outputs.
    Weights stored in `matmul_dtype` (bf16: MXU-native); biases stay f32 (added
    to the f32 accumulator).
    """
    f32 = lambda a: jnp.asarray(a, jnp.float32)
    wa1, wa2, wa3 = f32(params["actor_w1"]).T, f32(params["actor_w2"]).T, f32(params["actor_w3"]).T
    wc1, wc2, wc3 = f32(params["critic_w1"]).T, f32(params["critic_w2"]).T, f32(params["critic_w3"]).T
    ba1, ba2, ba3 = f32(params["actor_b1"]), f32(params["actor_b2"]), f32(params["actor_b3"])
    bc1, bc2, bc3 = f32(params["critic_b1"]), f32(params["critic_b2"]), f32(params["critic_b3"])

    ha1, ha2, action_dim = wa1.shape[1], wa2.shape[1], wa3.shape[1]
    hc1, hc2 = wc1.shape[1], wc2.shape[1]
    h1, h2 = ha1 + hc1, ha2 + hc2
    out_pad = _round_up(action_dim + 1, 128)

    # Layer 1: concat along output axis.
    w1f = jnp.concatenate([wa1, wc1], axis=1)
    b1f = jnp.concatenate([ba1, bc1]).reshape(1, h1)

    # Layer 2: block-diagonal.
    w2f = jnp.zeros((h1, h2), jnp.float32)
    w2f = w2f.at[:ha1, :ha2].set(wa2)
    w2f = w2f.at[ha1:, ha2:].set(wc2)
    b2f = jnp.concatenate([ba2, bc2]).reshape(1, h2)

    # Layer 3: block-structured, lane-padded to 128.
    w3f = jnp.zeros((h2, out_pad), jnp.float32)
    w3f = w3f.at[:ha2, :action_dim].set(wa3)
    w3f = w3f.at[ha2:, action_dim:action_dim + 1].set(wc3)
    b3f = jnp.zeros((1, out_pad), jnp.float32)
    b3f = b3f.at[0, :action_dim].set(ba3)
    b3f = b3f.at[0, action_dim].set(bc3[0])

    return {
        "w1": w1f.astype(matmul_dtype), "b1": b1f,
        "w2": w2f.astype(matmul_dtype), "b2": b2f,
        "w3": w3f.astype(matmul_dtype), "b3": b3f,
        "action_dim": int(action_dim),
    }


@functools.partial(jax.jit, static_argnames=("action_dim", "out_dtype"))
def _forward_impl(x, w1, b1, w2, b2, w3, b3, *, action_dim, out_dtype):
    B, state_dim = x.shape
    h1, h2, out_pad = w1.shape[1], w2.shape[1], w3.shape[1]

    x = x.astype(w1.dtype)                 # bf16 input DMA (half the read bytes)

    # Tile-count-first batch tiling: at most one partially-padded tile, and an
    # even number of >=2 grid steps when B >= 16 so v7x can use both TCs.
    TB_MAX = 2048
    n_steps = pl.cdiv(B, TB_MAX)
    if B >= 16:
        n_steps = max(n_steps, 2)
        n_steps += n_steps % 2
    TB = _round_up(pl.cdiv(B, n_steps), 8)
    B_pad = n_steps * TB
    if B_pad != B:
        x = jnp.pad(x, ((0, B_pad - B), (0, 0)))   # fused by jit with the cast

    weight_bytes = sum(int(a.size) * a.dtype.itemsize for a in (w1, b1, w2, b2, w3, b3))
    cost = pl.CostEstimate(
        flops=2 * B_pad * (state_dim * h1 + h1 * h2 + h2 * out_pad),
        transcendentals=B_pad * out_pad,
        bytes_accessed=(B_pad * state_dim * x.dtype.itemsize
                        + weight_bytes
                        + B_pad * out_pad * jnp.dtype(out_dtype).itemsize),
    )

    out = pl.pallas_call(
        functools.partial(fused_actor_critic_kernel, action_dim=action_dim),
        out_shape=jax.ShapeDtypeStruct((B_pad, out_pad), out_dtype),
        grid=(n_steps,),
        in_specs=[
            pl.BlockSpec((TB, state_dim), lambda i: (i, 0)),   # streamed activations
            pl.BlockSpec(w1.shape, lambda i: (0, 0)),          # constant index_map:
            pl.BlockSpec(b1.shape, lambda i: (0, 0)),          #   weights stay resident,
            pl.BlockSpec(w2.shape, lambda i: (0, 0)),          #   no per-step re-DMA
            pl.BlockSpec(b2.shape, lambda i: (0, 0)),
            pl.BlockSpec(w3.shape, lambda i: (0, 0)),
            pl.BlockSpec(b3.shape, lambda i: (0, 0)),
        ],
        out_specs=pl.BlockSpec((TB, out_pad), lambda i: (i, 0)),
        compiler_params=pltpu.CompilerParams(
            dimension_semantics=("parallel",)),                # v7x: shard batch over 2 TCs
        cost_estimate=cost,
    )(x, w1, b1, w2, b2, w3, b3)

    # Slices fuse under jit; pad lanes already hold prob 0 if the slab is consumed raw.
    probs = out[:B, :action_dim]
    value = out[:B, action_dim:action_dim + 1]
    return probs, value


def actor_critic_forward(x, packed, *, out_dtype=jnp.bfloat16):
    """x: (B, state_dim) f32.  packed: output of pack_params (built once)."""
    return _forward_impl(
        x, packed["w1"], packed["b1"], packed["w2"], packed["b2"],
        packed["w3"], packed["b3"],
        action_dim=packed["action_dim"], out_dtype=out_dtype)


def init_params(key, state_dim, action_dim, actor_layers, critic_layers):
    """Deterministic PyTorch-Linear-style init: U(-1/sqrt(fan_in), 1/sqrt(fan_in))."""
    params = {}
    shapes = {
        "actor_w1": (actor_layers[0], state_dim), "actor_b1": (actor_layers[0],),
        "actor_w2": (actor_layers[1], actor_layers[0]), "actor_b2": (actor_layers[1],),
        "actor_w3": (action_dim, actor_layers[1]), "actor_b3": (action_dim,),
        "critic_w1": (critic_layers[0], state_dim), "critic_b1": (critic_layers[0],),
        "critic_w2": (critic_layers[1], critic_layers[0]), "critic_b2": (critic_layers[1],),
        "critic_w3": (1, critic_layers[1]), "critic_b3": (1,),
    }
    fan_in = {
        "actor_w1": state_dim, "actor_b1": state_dim,
        "actor_w2": actor_layers[0], "actor_b2": actor_layers[0],
        "actor_w3": actor_layers[1], "actor_b3": actor_layers[1],
        "critic_w1": state_dim, "critic_b1": state_dim,
        "critic_w2": critic_layers[0], "critic_b2": critic_layers[0],
        "critic_w3": critic_layers[1], "critic_b3": critic_layers[1],
    }
    keys = jax.random.split(key, len(shapes))
    for k, (name, shp) in zip(keys, shapes.items()):
        bound = 1.0 / jnp.sqrt(jnp.float32(fan_in[name]))
        params[name] = jax.random.uniform(k, shp, jnp.float32, -bound, bound)
    return params


def reference_forward(x, params):
    """Pure-JAX (f32) reference of the PyTorch forward."""
    def linear(h, w, b):
        return h @ w.T + b
    h = jax.nn.relu(linear(x, params["actor_w1"], params["actor_b1"]))
    h = jax.nn.relu(linear(h, params["actor_w2"], params["actor_b2"]))
    probs = jax.nn.softmax(linear(h, params["actor_w3"], params["actor_b3"]), axis=1)

    g = jax.nn.relu(linear(x, params["critic_w1"], params["critic_b1"]))
    g = jax.nn.relu(linear(g, params["critic_w2"], params["critic_b2"]))
    value = linear(g, params["critic_w3"], params["critic_b3"])
    return probs, value


if __name__ == "__main__":
    state_dim = 32
    action_dim = 8
    actor_layers = [32, 32]
    critic_layers = [32, 32]

    key = jax.random.PRNGKey(0)
    pkey, xkey1, xkey2 = jax.random.split(key, 3)
    params = init_params(pkey, state_dim, action_dim, actor_layers, critic_layers)
    packed = pack_params(params)       # one-time packing (bf16 weights, amortized)

    # --- Case 1: tiny batch, f32 output slab (tight check of the math path) ---
    x1 = jax.random.normal(xkey1, (8, state_dim), jnp.float32)
    probs1, value1 = actor_critic_forward(x1, packed, out_dtype=jnp.float32)
    jax.block_until_ready((probs1, value1))
    rp1, rv1 = reference_forward(x1, params)
    assert probs1.shape == (8, action_dim) and value1.shape == (8, 1)
    assert jnp.allclose(jnp.sum(probs1, axis=1), 1.0, atol=1e-4)   # exact divide
    assert jnp.allclose(probs1, rp1, atol=1e-2), float(jnp.max(jnp.abs(probs1 - rp1)))
    assert jnp.allclose(value1, rv1, atol=1e-2), float(jnp.max(jnp.abs(value1 - rv1)))

    # --- Case 2: ragged batch, default bf16 output slab, grid of 2 steps ---
    x2 = jax.random.normal(xkey2, (37, state_dim), jnp.float32)
    probs2, value2 = actor_critic_forward(x2, packed)              # bf16 output
    jax.block_until_ready((probs2, value2))
    rp2, rv2 = reference_forward(x2, params)
    p2 = probs2.astype(jnp.float32)
    v2 = value2.astype(jnp.float32)
    assert probs2.shape == (37, action_dim) and value2.shape == (37, 1)
    assert jnp.allclose(jnp.sum(p2, axis=1), 1.0, atol=1e-2)       # bf16 quantization only
    assert jnp.allclose(p2, rp2, atol=2e-2), float(jnp.max(jnp.abs(p2 - rp2)))
    assert jnp.allclose(v2, rv2, atol=2e-2), float(jnp.max(jnp.abs(v2 - rv2)))

    print("KERNEL_OK")
</pallas_src>

<mosaic_0001>
module attributes {stable_mosaic.version = 11 : i64} {
  func.func @fused_actor_critic_kernel(%arg0: i32, %arg1: memref<8x32xbf16, #tpu.memory_space<vmem>>, %arg2: memref<32x64xbf16, #tpu.memory_space<vmem>>, %arg3: memref<1x64xf32, #tpu.memory_space<vmem>>, %arg4: memref<64x64xbf16, #tpu.memory_space<vmem>>, %arg5: memref<1x64xf32, #tpu.memory_space<vmem>>, %arg6: memref<64x128xbf16, #tpu.memory_space<vmem>>, %arg7: memref<1x128xf32, #tpu.memory_space<vmem>>, %arg8: memref<8x128xf32, #tpu.memory_space<vmem>>) attributes {dimension_semantics = [#tpu.dimension_semantics<parallel>], iteration_bounds = array<i64: 1>, scalar_prefetch = 0 : i64, scratch_operands = 0 : i64, tpu.core_type = #tpu.core_type<tc>, window_params = [{transform_indices = @transform_0, window_bounds = array<i64: 8, 32>}, {pipeline_mode = #tpu.pipeline_mode<synchronous>, transform_indices = @transform_1, window_bounds = array<i64: 32, 64>}, {pipeline_mode = #tpu.pipeline_mode<synchronous>, transform_indices = @transform_2, window_bounds = array<i64: 1, 64>}, {pipeline_mode = #tpu.pipeline_mode<synchronous>, transform_indices = @transform_3, window_bounds = array<i64: 64, 64>}, {pipeline_mode = #tpu.pipeline_mode<synchronous>, transform_indices = @transform_4, window_bounds = array<i64: 1, 64>}, {pipeline_mode = #tpu.pipeline_mode<synchronous>, transform_indices = @transform_5, window_bounds = array<i64: 64, 128>}, {pipeline_mode = #tpu.pipeline_mode<synchronous>, transform_indices = @transform_6, window_bounds = array<i64: 1, 128>}, {transform_indices = @transform_7, window_bounds = array<i64: 8, 128>}]} {
    %c0 = arith.constant 0 : index
    %c0_0 = arith.constant 0 : index
    %0 = vector.load %arg1[%c0, %c0_0] : memref<8x32xbf16, #tpu.memory_space<vmem>>, vector<8x32xbf16>
    %c0_1 = arith.constant 0 : index
    %c0_2 = arith.constant 0 : index
    %1 = vector.load %arg2[%c0_1, %c0_2] : memref<32x64xbf16, #tpu.memory_space<vmem>>, vector<32x64xbf16>
    %cst = arith.constant dense<0.000000e+00> : vector<8x64xf32>
    %2 = tpu.matmul %0, %1, %cst {dimension_numbers = #tpu.dot_dimension_numbers<[1], [0], [0], [1], [0, 0, 1, 1], [], []>} : vector<8x32xbf16>, vector<32x64xbf16>, vector<8x64xf32> -> vector<8x64xf32>
    %c0_3 = arith.constant 0 : index
    %c0_4 = arith.constant 0 : index
    %3 = vector.load %arg3[%c0_3, %c0_4] : memref<1x64xf32, #tpu.memory_space<vmem>>, vector<1x64xf32>
    %4 = vector.broadcast %3 : vector<1x64xf32> to vector<8x64xf32>
    %5 = arith.addf %2, %4 : vector<8x64xf32>
    %cst_5 = arith.constant 0.000000e+00 : f32
    %6 = vector.broadcast %cst_5 : f32 to vector<8x64xf32>
    %7 = arith.maximumf %5, %6 : vector<8x64xf32>
    %8 = arith.truncf %7 : vector<8x64xf32> to vector<8x64xbf16>
    %c0_6 = arith.constant 0 : index
    %c0_7 = arith.constant 0 : index
    %9 = vector.load %arg4[%c0_6, %c0_7] : memref<64x64xbf16, #tpu.memory_space<vmem>>, vector<64x64xbf16>
    %cst_8 = arith.constant dense<0.000000e+00> : vector<8x64xf32>
    %10 = tpu.matmul %8, %9, %cst_8 {dimension_numbers = #tpu.dot_dimension_numbers<[1], [0], [0], [1], [0, 0, 1, 1], [], []>} : vector<8x64xbf16>, vector<64x64xbf16>, vector<8x64xf32> -> vector<8x64xf32>
    %c0_9 = arith.constant 0 : index
    %c0_10 = arith.constant 0 : index
    %11 = vector.load %arg5[%c0_9, %c0_10] : memref<1x64xf32, #tpu.memory_space<vmem>>, vector<1x64xf32>
    %12 = vector.broadcast %11 : vector<1x64xf32> to vector<8x64xf32>
    %13 = arith.addf %10, %12 : vector<8x64xf32>
    %cst_11 = arith.constant 0.000000e+00 : f32
    %14 = vector.broadcast %cst_11 : f32 to vector<8x64xf32>
    %15 = arith.maximumf %13, %14 : vector<8x64xf32>
    %16 = arith.truncf %15 : vector<8x64xf32> to vector<8x64xbf16>
    %c0_12 = arith.constant 0 : index
    %c0_13 = arith.constant 0 : index
    %17 = vector.load %arg6[%c0_12, %c0_13] : memref<64x128xbf16, #tpu.memory_space<vmem>>, vector<64x128xbf16>
    %cst_14 = arith.constant dense<0.000000e+00> : vector<8x128xf32>
    %18 = tpu.matmul %16, %17, %cst_14 {dimension_numbers = #tpu.dot_dimension_numbers<[1], [0], [0], [1], [0, 0, 1, 1], [], []>} : vector<8x64xbf16>, vector<64x128xbf16>, vector<8x128xf32> -> vector<8x128xf32>
    %c0_15 = arith.constant 0 : index
    %c0_16 = arith.constant 0 : index
    %19 = vector.load %arg7[%c0_15, %c0_16] : memref<1x128xf32, #tpu.memory_space<vmem>>, vector<1x128xf32>
    %20 = vector.broadcast %19 : vector<1x128xf32> to vector<8x128xf32>
    %21 = arith.addf %18, %20 : vector<8x128xf32>
    %22 = tpu.iota {dimensions = array<i32: 1>} : vector<1x128xi32>
    %c8_i32 = arith.constant 8 : i32
    %23 = vector.broadcast %c8_i32 : i32 to vector<1x128xi32>
    %24 = arith.cmpi slt, %22, %23 : vector<1x128xi32>
    %cst_17 = arith.constant -1.000000e+30 : f32
    %25 = vector.shape_cast %24 : vector<1x128xi1> to vector<1x128xi1>
    %26 = vector.broadcast %25 : vector<1x128xi1> to vector<8x128xi1>
    %27 = vector.broadcast %cst_17 : f32 to vector<8x128xf32>
    %28 = arith.select %26, %21, %27 : vector<8x128xi1>, vector<8x128xf32>
    %cst_18 = arith.constant dense<0xFF800000> : vector<8xf32>
    %29 = vector.multi_reduction <maximumf>, %28, %cst_18 [1] : vector<8x128xf32> to vector<8xf32>
    %30 = vector.shape_cast %29 : vector<8xf32> to vector<8x1xf32>
    %31 = vector.broadcast %30 : vector<8x1xf32> to vector<8x128xf32>
    %32 = arith.subf %28, %31 : vector<8x128xf32>
    %33 = math.exp %32 : vector<8x128xf32>
    %cst_19 = arith.constant dense<0.000000e+00> : vector<8xf32>
    %34 = vector.multi_reduction <add>, %33, %cst_19 [1] : vector<8x128xf32> to vector<8xf32>
    %35 = vector.shape_cast %34 : vector<8xf32> to vector<8x1xf32>
    %36 = vector.broadcast %35 : vector<8x1xf32> to vector<8x128xf32>
    %37 = arith.divf %33, %36 : vector<8x128xf32>
    %c8_i32_20 = arith.constant 8 : i32
    %38 = vector.broadcast %c8_i32_20 : i32 to vector<1x128xi32>
    %39 = arith.cmpi eq, %22, %38 : vector<1x128xi32>
    %40 = vector.shape_cast %39 : vector<1x128xi1> to vector<1x128xi1>
    %41 = vector.broadcast %40 : vector<1x128xi1> to vector<8x128xi1>
    %42 = arith.select %41, %21, %37 : vector<8x128xi1>, vector<8x128xf32>
    %c0_21 = arith.constant 0 : index
    %c0_22 = arith.constant 0 : index
    %43 = vector.load %arg8[%c0_21, %c0_22] : memref<8x128xf32, #tpu.memory_space<vmem>>, vector<8x128xf32>
    tpu.vector_store %arg8[%c0_21, %c0_22], %42 {strides = array<i32>} : memref<8x128xf32, #tpu.memory_space<vmem>>, vector<8x128xf32>,
    return
  }
  func.func @transform_0(%arg0: i32) -> (i32, i32) {
    %c0_i32 = arith.constant 0 : i32
    %c0_i32_0 = arith.constant 0 : i32
    return %arg0, %c0_i32 : i32, i32
  }
  func.func @transform_1(%arg0: i32) -> (i32, i32) {
    %c0_i32 = arith.constant 0 : i32
    %c0_i32_0 = arith.constant 0 : i32
    %c0_i32_1 = arith.constant 0 : i32
    return %c0_i32, %c0_i32_0 : i32, i32
  }
  func.func @transform_2(%arg0: i32) -> (i32, i32) {
    %c0_i32 = arith.constant 0 : i32
    %c0_i32_0 = arith.constant 0 : i32
    %c0_i32_1 = arith.constant 0 : i32
    return %c0_i32, %c0_i32_0 : i32, i32
  }
  func.func @transform_3(%arg0: i32) -> (i32, i32) {
    %c0_i32 = arith.constant 0 : i32
    %c0_i32_0 = arith.constant 0 : i32
    %c0_i32_1 = arith.constant 0 : i32
    return %c0_i32, %c0_i32_0 : i32, i32
  }
  func.func @transform_4(%arg0: i32) -> (i32, i32) {
    %c0_i32 = arith.constant 0 : i32
    %c0_i32_0 = arith.constant 0 : i32
    %c0_i32_1 = arith.constant 0 : i32
    return %c0_i32, %c0_i32_0 : i32, i32
  }
  func.func @transform_5(%arg0: i32) -> (i32, i32) {
    %c0_i32 = arith.constant 0 : i32
    %c0_i32_0 = arith.constant 0 : i32
    %c0_i32_1 = arith.constant 0 : i32
    return %c0_i32, %c0_i32_0 : i32, i32
  }
  func.func @transform_6(%arg0: i32) -> (i32, i32) {
    %c0_i32 = arith.constant 0 : i32
    %c0_i32_0 = arith.constant 0 : i32
    %c0_i32_1 = arith.constant 0 : i32
    return %c0_i32, %c0_i32_0 : i32, i32
  }
  func.func @transform_7(%arg0: i32) -> (i32, i32) {
    %c0_i32 = arith.constant 0 : i32
    %c0_i32_0 = arith.constant 0 : i32
    return %arg0, %c0_i32 : i32, i32
  }
}

</mosaic_0001>

<bundles_post_ra>
// kernel: _forward_impl.1
= control target key start
LH: loop header
LB: loop body
LE: loop exit
PB: predicated region body
PF: predicated region fallthrough
CT: control target
= control target key end

     0   :  { %12 = vsyncpa [#allocation3], 0  ;;  %s602_s0 = inlined_call_operand.vmem [shape: bf16[8,32], index: 0, kind: input, shape index: {}]   ;;  %s603_s1 = inlined_call_operand.hbm [shape: bf16[32,64], index: 1, kind: input, shape index: {}]   ;;  %s604_s2 = inlined_call_operand.vmem [shape: f32[1,64], index: 2, kind: input, shape index: {}]   ;;  %s605_s3 = inlined_call_operand.hbm [shape: bf16[64,64], index: 3, kind: input, shape index: {}]   ;;  %s606_s4 = inlined_call_operand.vmem [shape: f32[1,64], index: 4, kind: input, shape index: {}]   ;;  %s607_s5 = inlined_call_operand.hbm [shape: bf16[64,128], index: 5, kind: input, shape index: {}]   ;;  %s608_s6 = inlined_call_operand.vmem [shape: f32[1,128], index: 6, kind: input, shape index: {}]   ;;  %s609_s7 = inlined_call_operand.vmem [shape: f32[8,128], index: 7, kind: output, shape index: {}]  }
   0x1   :  { %13 = vsyncpa [#allocation5], 0  ;;  %s483_s24 = smov [#allocation4]   ;;  %s484_s26 = smov [#allocation2]  }
   0x2   :  { %s35_s25 = sshll.u32 %s483_s24, 4  ;;  %s21_s27 = sshll.u32 %s484_s26, 4  ;;  %s36_s25 = int_to_ptr.vmem [resolvable:$true] %s35_s25  ;;  %s530_s27 = int_to_ptr.vmem [resolvable:$true] %s21_s27 }
   0x3   :  { %s413_s30 = scalar_lea.hbm %s605_s3, 512 }
   0x4   :  { %p414_p0 = scmp.ne.s32.totalorder %s605_s3, %s413_s30  ;;  %p417_p1 = scmp.lt.u32.totalorder %s413_s30, %s605_s3 }
   0x6   :  { %p419_p2 = pnand %p417_p1, %p414_p0 }
   0x8   :  { %422 = shalt.err (!%p419_p2)
}
   0x9   :  { %s423_s12 = scalar_lea.vmem %s36_s25, 512  ;;  %p428_p4 = scmp.lt.s32.totalorder %s36_s25, %s36_s25 }
   0xa   :  { %p424_p3 = scmp.ne.s32.totalorder %s36_s25, %s423_s12  ;;  %p429_p5 = scmp.lt.s32.totalorder %s423_s12, %s423_s12 }
   0xc   :  { %p430_p6 = por %p429_p5, %p428_p4 }
   0xe   :  { %p431_p7 = pnand %p430_p6, %p424_p3 }
  0x10   :  { %434 = shalt.err (!%p431_p7)
}
  0x11   :  { %s485_s13 = smov 64   ;;  %s486_s14 = smov 4  }
  0x12   :  { %41 = dma.hbm_to_vmem [thread:$0]  %s605_s3, 512, %s36_s25, [#allocation5], %s485_s13, %s485_s13, %s486_s14  }
  0x13   :  { %s435_s19 = scalar_lea.hbm %s603_s1, 256 }
  0x14   :  { %p436_p8 = scmp.ne.s32.totalorder %s603_s1, %s435_s19  ;;  %p439_p9 = scmp.lt.u32.totalorder %s435_s19, %s603_s1 }
  0x16   :  { %p441_p10 = pnand %p439_p9, %p436_p8 }
  0x18   :  { %444 = shalt.err (!%p441_p10)
}
  0x19   :  { %s445_s24 = scalar_lea.vmem %s530_s27, 256  ;;  %p450_p12 = scmp.lt.s32.totalorder %s530_s27, %s530_s27 }
  0x1a   :  { %p446_p11 = scmp.ne.s32.totalorder %s530_s27, %s445_s24  ;;  %p451_p13 = scmp.lt.s32.totalorder %s445_s24, %s445_s24 }
  0x1c   :  { %p452_p0 = por %p451_p13, %p450_p12 }
  0x1e   :  { %p453_p1 = pnand %p452_p0, %p446_p11 }
  0x20   :  { %456 = shalt.err (!%p453_p1)
}
  0x21   :  { %27 = dma.hbm_to_vmem [thread:$0]  %s603_s1, 256, %s530_s27, [#allocation3], %s485_s13, %s485_s13, %s486_s14  }
  0x22   :  { %s487_s26 = smov [#allocation6]   ;;  %s457_s8 = scalar_lea.hbm %s607_s5, 512 }
  0x23   :  { %s49_s28 = sshll.u32 %s487_s26, 4  ;;  %p458_p2 = scmp.ne.s32.totalorder %s607_s5, %s457_s8  ;;  %s50_s28 = int_to_ptr.vmem [resolvable:$true] %s49_s28 }
  0x24   :  { %p461_p3 = scmp.lt.u32.totalorder %s457_s8, %s607_s5 }
  0x26   :  { %p463_p4 = pnand %p461_p3, %p458_p2 }
  0x28   :  { %466 = shalt.err (!%p463_p4)
}
  0x29   :  { %s467_s15 = scalar_lea.vmem %s50_s28, 512  ;;  %p472_p6 = scmp.lt.s32.totalorder %s50_s28, %s50_s28 }
  0x2a   :  { %p468_p5 = scmp.ne.s32.totalorder %s50_s28, %s467_s15  ;;  %p473_p7 = scmp.lt.s32.totalorder %s467_s15, %s467_s15 }
  0x2c   :  { %p474_p8 = por %p473_p7, %p472_p6 }
  0x2e   :  { %p475_p9 = pnand %p474_p8, %p468_p5 }
  0x30   :  { %478 = shalt.err (!%p475_p9)
}
  0x31   :  { %55 = dma.hbm_to_vmem [thread:$0]  %s607_s5, 512, %s50_s28, [#allocation5], %s485_s13, %s485_s13, %s486_s14  }
  0x32   :  { %479 = dma.done.wait [#allocation3], 256  }
  0x33   :  { %480 = vsyncadd [#allocation3], 4294967040 }
  0x34   :  { %481 = dma.done.wait [#allocation5], 1024  }
  0x35   :  { %482 = vsyncadd [#allocation5], 4294966272  ;;  %v488_v0 = vmov 0.0   ;;  %vm489_vm0 = vmmov 0   ;;  %v399_v1 = vld [vmem:[#allocation2] sm:$0xff]   ;;  %v400_v2 = vld [vmem:[#allocation2 + $0x8] sm:$0xff]   ;;  %v305_v28 = vlaneseq }
  0x36   :  { %360 = vmatprep.subr.bf16.mxu0 %v488_v0  ;;  %364 = vmatprep.mubr.msk.bf16.mxu0 %vm489_vm0, %v488_v0  ;;  %v401_v3 = vld [vmem:[#allocation4] sm:$0xff]   ;;  %v68_v4 = vld [vmem:[%s602_s0] sm:$0xf]  ;;  %vm92_vm1 = vcmask 261120   ;;  %v403_v6 = vld [vmem:[#allocation4 + $0x10] sm:$0xff]   ;;  %vm177_vm2 = vcmask 523264  }
  0x37   :  { %368 = vmatprep.subr.bf16.mxu1 %v488_v0  ;;  %376 = vmatprep.mubr.msk.bf16.mxu1 %vm489_vm0, %v488_v0  ;;  %v402_v5 = vld [vmem:[#allocation4 + $0x8] sm:$0xff]   ;;  %v404_v7 = vld [vmem:[#allocation4 + $0x18] sm:$0xff]   ;;  %v405_v8 = vld [vmem:[#allocation6] sm:$0xff]   ;;  %v306_v29 = vand.u32 127, %v305_v28 }
  0x38   :  { %361 = vmatpush3.bf16.msra.mxu0 %v399_v1  ;;  %369 = vmatpush3.bf16.msra.mxu1 %v401_v3  ;;  %v406_v9 = vld [vmem:[#allocation6 + $0x8] sm:$0xff]   ;;  %v407_v18 = vld [vmem:[#allocation6 + $0x10] sm:$0xff]   ;;  %v408_v19 = vld [vmem:[#allocation6 + $0x18] sm:$0xff]  }
  0x39   :  { %362 = vmatprep.subr.bf16.mxu0 %v488_v0  ;;  %370 = vmatprep.subr.bf16.mxu1 %v488_v0  ;;  %v331_v10 = vld [vmem:[%s604_s2] ss:$0 sm:$0xff]  ;;  %vm307_vm3 = vcmp.lt.s32.totalorder %v306_v29, 8  ;;  %vm320_vm4 = vcmp.eq.s32.totalorder %v306_v29, 8 }
  0x3a   :  { %v335_v20 = vld [vmem:[%s606_s4] ss:$0 sm:$0xff] }
  0x3b   :  { %v341_v30 = vld [vmem:[%s608_s6] ss:$0 sm:$0xff] }
  0x3c   :  { %363 = vmatpush3.bf16.msra.mxu0 %v400_v2  ;;  %371 = vmatpush3.bf16.msra.mxu1 %v402_v5 }
  0x3d   :  { %380 = vmatprep.subr.bf16.mxu0 %v488_v0  ;;  %372 = vmatprep.subr.bf16.mxu1 %v488_v0 }
  0x3f   :  { %365 = vmatmul.mubr.msk.bf16.vlgmr.msra.gmra.mrb[0].mxu0 %vm92_vm1, %v68_v4 }
  0x40   :  { %388 = vmatprep.mubr.msk.bf16.mxu0 %vm489_vm0, %v488_v0  ;;  %373 = vmatpush3.bf16.msra.mxu1 %v403_v6 }
  0x41   :  { %374 = vmatprep.subr.bf16.mxu1 %v488_v0  ;;  %381 = vmatpush3.bf16.msra.mxu0 %v405_v8 }
  0x42   :  { %382 = vmatprep.subr.bf16.mxu0 %v488_v0 }
  0x44   :  { %375 = vmatpush3.bf16.msra.mxu1 %v404_v7 }
  0x45   :  { %383 = vmatpush3.bf16.msra.mxu0 %v406_v9 }
  0x46   :  { %384 = vmatprep.subr.bf16.mxu0 %v488_v0 }
  0x49   :  { %385 = vmatpush3.bf16.msra.mxu0 %v407_v18 }
  0x4a   :  { %386 = vmatprep.subr.bf16.mxu0 %v488_v0 }
  0x4d   :  { %387 = vmatpush3.bf16.msra.mxu0 %v408_v19 }
 0x112   :  { %v130_v11 = vpop.f32.mrb[0].mxu0 }
 0x113   :  { %v131_v12 = vadd.f32 %v331_v10, %v130_v11  ;;  %v366_v13 = vpop.f32.mrb[1].mxu0 }
 0x114   :  { %v133_v14 = vpop.f32.mrb[2].mxu0 }
 0x115   :  { %v136_v15 = vmax.f32 %v131_v12, 0.0  ;;  %v367_v16 = vpop.f32.mrb[3].mxu0 }
 0x117   :  { %v137_v17 = vpack.c.bf16 %v136_v15, %v136_v15 }
 0x119   :  { %377 = vmatmul.mubr.msk.bf16.vlgmr.msra.gmra.mrb[0].mxu1 %vm177_vm2, %v137_v17 }
 0x1ec   :  { %v215_v21 = vpop.f32.mrb[0].mxu1 }
 0x1ed   :  { %v216_v22 = vadd.f32 %v335_v20, %v215_v21  ;;  %v378_v23 = vpop.f32.mrb[1].mxu1 }
 0x1ee   :  { %v218_v24 = vpop.f32.mrb[2].mxu1 }
 0x1ef   :  { %v221_v25 = vmax.f32 %v216_v22, 0.0  ;;  %v379_v26 = vpop.f32.mrb[3].mxu1 }
 0x1f1   :  { %v222_v27 = vpack.c.bf16 %v221_v25, %v221_v25 }
 0x1f3   :  { %389 = vmatmul.mubr.msk.bf16.vlgmr.msra.gmra.mrb[4].mxu0 %vm177_vm2, %v222_v27 }
 0x2c6   :  { %v299_v31 = vpop.f32.mrb[4].mxu0 }
 0x2c7   :  { %v300_v32 = vadd.f32 %v341_v30, %v299_v31  ;;  %v390_v33 = vpop.f32.mrb[5].mxu0 }
 0x2c8   :  { %v302_v34 = vpop.f32.mrb[6].mxu0 }
 0x2c9   :  { %v391_v35 = vpop.f32.mrb[7].mxu0  ;;  %v310_v36 = vsel %vm307_vm3, %v300_v32, -1e+30 }
 0x2ca   :  { %311 = vmax.xlane.f32.xlu0 %v310_v36 }
 0x357   :  { %v312_v37 = vpop.xlane.xlu0 %311 }
 0x358   :  { %v313_v38 = vsub.f32 %v310_v36, %v312_v37 }
 0x35a   :  { %v314_v39 = vmul.f32 1.442695, %v313_v38 }
 0x35c   :  { %409 = vpow2.f32 %v314_v39 }
 0x366   :  { %v410_v40 = vpop.eup %409 }
 0x367   :  { %316 = vadd.xlane.f32.xlu0 %v410_v40 }
 0x3f4   :  { %v317_v41 = vpop.xlane.xlu0 %316 }
 0x3f5   :  { %411 = vrcp.f32 %v317_v41 }
 0x3ff   :  { %v412_v42 = vpop.eup %411 }
 0x400   :  { %v319_v43 = vmul.f32 %v412_v42, %v410_v40 }
 0x402   :  { %v323_v44 = vsel %vm320_vm4, %v300_v32, %v319_v43 }
 0x403   :  { %324 = vst [vmem:[%s609_s7] sm:$0xff] %v323_v44 }
 0x404   :  { %329 = vsyncpa [#allocation3], 1 }
 0x405   :  { %330 = vsyncpa [#allocation5], 1 }

</bundles_post_ra>
